<compile_context>
chip_gen: v7x
topology: tpu7x:2x2x1
jax: 0.10.0
libtpu: 0.0.40
codegen_flags: <defaults>
</compile_context>

<pallas_src>
import functools

import jax
import jax.numpy as jnp
from jax.experimental import pallas as pl
from jax.experimental.pallas import tpu as pltpu


def _round_up(x, m):
    return ((x + m - 1) // m) * m


def _cdiv(a, b):
    return (a + b - 1) // b


def _vmem_capacity_bytes():
    """Per-core VMEM capacity; conservative 64 MiB (v7x) if the query fails."""
    try:
        info = pltpu.get_tpu_info()
        cap = getattr(info, "vmem_capacity_bytes", None)
        if cap:
            return int(cap)
    except Exception:
        pass
    return 64 << 20


def _se_branch(pooled_f32, w1t_ref, b1_ref, w2_ref, b2_ref):
    """Squeeze-excite branch on a (C, 1) f32 pooled vector -> (C, 1) f32 scale."""
    # 1x1 conv #1 + ReLU: h[r] = sum_c w1[r, c] * pooled[c] + b1[r] -> (1, Cr)
    h = jnp.sum(w1t_ref[...].astype(jnp.float32) * pooled_f32,
                axis=0, keepdims=True) + b1_ref[...].astype(jnp.float32)
    h = jnp.maximum(h, 0.0)
    # 1x1 conv #2 + sigmoid: z[c] = sum_r w2[c, r] * h[r] + b2[c] -> (C, 1)
    z = jnp.sum(w2_ref[...].astype(jnp.float32) * h,
                axis=1, keepdims=True) + b2_ref[...].astype(jnp.float32)
    return jax.nn.sigmoid(z)


def _fused_kernel(x_ref, w1t_ref, b1_ref, w2_ref, b2_ref, o_ref, *, inv_hw):
    """Grid (N,): whole (1, C, HWp) image resident; pool + SE + rescale."""
    x = x_ref[0]                                                    # (C, HWp)
    pooled = jnp.sum(x.astype(jnp.float32), axis=-1, keepdims=True) * inv_hw
    s = _se_branch(pooled, w1t_ref, b1_ref, w2_ref, b2_ref)         # (C, 1) f32
    # Multiply in the activation dtype; for bf16 inputs the f32 sigmoid scale
    # is cast down first (small, documented tolerance vs an all-f32 reference).
    o_ref[0] = x * s.astype(o_ref.dtype)


def _pool_se_kernel(x_ref, w1t_ref, b1_ref, w2_ref, b2_ref, s_ref, acc_ref, *,
                    inv_hw):
    """Grid (N, T): accumulate channel sums over HW tiles, then SE branch.

    Relies on T being the innermost, sequentially iterated ("arbitrary") axis.
    """
    t = pl.program_id(1)

    @pl.when(t == 0)
    def _init():
        acc_ref[...] = jnp.zeros_like(acc_ref)

    x = x_ref[0]                                                    # (C, tile)
    # NOTE: per-tile cross-lane reduce goes to the XLU; this kernel is HBM
    # bound, so a lane-wide (C, 128) accumulator is not worth the reshapes.
    acc_ref[...] += jnp.sum(x.astype(jnp.float32), axis=-1, keepdims=True)

    @pl.when(t == pl.num_programs(1) - 1)
    def _finalize():
        pooled = acc_ref[...] * inv_hw                              # (C, 1)
        s = _se_branch(pooled, w1t_ref, b1_ref, w2_ref, b2_ref)
        s_ref[0] = s.astype(s_ref.dtype)


def _rescale_kernel(x_ref, s_ref, o_ref):
    """Grid (N, T): o = x * s, (C, 1) scale broadcast over the HW lane axis."""
    s = s_ref[0].astype(o_ref.dtype)
    o_ref[0] = x_ref[0] * s


def _plan_hw_tiling(hw, c, itemsize, *, target_block_bytes=2 << 20,
                    max_tile=16384):
    """Lane-dense HW tile (~1-4 MiB blocks) and the padded HW extent."""
    hw128 = _round_up(hw, 128)
    tile_target = target_block_bytes // max(1, c * itemsize)
    tile_target = max(128, min(max_tile, (tile_target // 128) * 128))
    if hw128 <= tile_target:
        return hw128, 1, hw128
    num_tiles = _cdiv(hw128, tile_target)
    tile = _round_up(_cdiv(hw128, num_tiles), 128)
    return tile, num_tiles, tile * num_tiles


def ca_layer(x_nchw, w1, b1, w2, b2, *, force_two_pass=False, hw_tile=None):
    """CALayer forward.

    x_nchw: (N, C, H, W); w1: (Cr, C) conv1 weight; b1: (Cr,);
    w2: (C, Cr) conv2 weight; b2: (C,).
    """
    N, C, H, W = x_nchw.shape
    Cr = w1.shape[0]
    HW = H * W
    itemsize = jnp.dtype(x_nchw.dtype).itemsize
    vmem_cap = _vmem_capacity_bytes()
    weight_bytes = int((w1.size + b1.size + w2.size + b2.size) * 4)

    # ---- choose fused vs two-pass, and the padded HW extent ----------------
    hw128 = _round_up(HW, 128)
    fused_block_bytes = C * hw128 * itemsize
    # double-buffered in + out blocks + double-buffered (tiny) weights + slack
    fused_need = 4 * fused_block_bytes + 4 * weight_bytes + (1 << 20)
    use_fused = (not force_two_pass) and fused_need <= vmem_cap // 2

    if use_fused:
        tile, T, hw_pad = hw128, 1, hw128
        vmem_need = fused_need
    else:
        if hw_tile is not None:
            assert hw_tile % 128 == 0, "hw_tile must be a multiple of 128"
            tile = hw_tile
            T = _cdiv(hw128, tile)
            hw_pad = tile * T
        else:
            tile, T, hw_pad = _plan_hw_tiling(HW, C, itemsize)
        vmem_need = 4 * C * tile * itemsize + 4 * weight_bytes + (2 << 20)

    vmem_limit = int(min(vmem_cap * 7 // 8, max(vmem_need, 32 << 20)))

    # Free view NCHW -> (N, C, HW); zero-pad HW to the lane-dense extent.
    x = x_nchw.reshape(N, C, HW)
    if hw_pad != HW:
        x = jnp.pad(x, ((0, 0), (0, 0), (0, hw_pad - HW)))

    w1t = w1.T                       # (C, Cr)  tiny, one-time
    b1_row = b1.reshape(1, Cr)
    b2_col = b2.reshape(C, 1)
    inv_hw = 1.0 / HW                # true HW: zero-padded lanes are sum-safe

    x_bytes = N * C * hw_pad * itemsize

    if use_fused:
        # ---- fused per-image kernel: 1 read + 1 write of x ------------------
        fused = functools.partial(_fused_kernel, inv_hw=inv_hw)
        out = pl.pallas_call(
            fused,
            out_shape=jax.ShapeDtypeStruct((N, C, hw_pad), x.dtype),
            grid_spec=pltpu.PrefetchScalarGridSpec(
                num_scalar_prefetch=0,
                grid=(N,),
                in_specs=[
                    pl.BlockSpec((1, C, hw_pad), lambda n: (n, 0, 0)),
                    pl.BlockSpec((C, Cr), lambda n: (0, 0)),
                    pl.BlockSpec((1, Cr), lambda n: (0, 0)),
                    pl.BlockSpec((C, Cr), lambda n: (0, 0)),
                    pl.BlockSpec((C, 1), lambda n: (0, 0)),
                ],
                out_specs=pl.BlockSpec((1, C, hw_pad), lambda n: (n, 0, 0)),
            ),
            compiler_params=pltpu.CompilerParams(
                dimension_semantics=("parallel",),
                vmem_limit_bytes=vmem_limit),
            cost_estimate=pl.CostEstimate(
                flops=int(2 * N * C * hw_pad + 4 * N * C * Cr),
                transcendentals=int(N * C),
                bytes_accessed=int(2 * x_bytes + weight_bytes)),
        )(x, w1t, b1_row, w2, b2_col)
    else:
        # ---- kernel 1: tiled pooled mean + SE branch -> s of shape (N, C, 1)
        # TODO(synk): for N == 1 on v7x, split T as (N, 2, T//2) with the
        # middle axis "parallel" and fold the two partial sums in finalize so
        # both TensorCores share the reduction.
        pool = functools.partial(_pool_se_kernel, inv_hw=inv_hw)
        s = pl.pallas_call(
            pool,
            out_shape=jax.ShapeDtypeStruct((N, C, 1), jnp.float32),
            grid_spec=pltpu.PrefetchScalarGridSpec(
                num_scalar_prefetch=0,
                grid=(N, T),
                in_specs=[
                    pl.BlockSpec((1, C, tile), lambda n, t: (n, 0, t)),
                    pl.BlockSpec((C, Cr), lambda n, t: (0, 0)),
                    pl.BlockSpec((1, Cr), lambda n, t: (0, 0)),
                    pl.BlockSpec((C, Cr), lambda n, t: (0, 0)),
                    pl.BlockSpec((C, 1), lambda n, t: (0, 0)),
                ],
                out_specs=pl.BlockSpec((1, C, 1), lambda n, t: (n, 0, 0)),
                scratch_shapes=[pltpu.VMEM((C, 1), jnp.float32)],
            ),
            compiler_params=pltpu.CompilerParams(
                dimension_semantics=("parallel", "arbitrary"),
                vmem_limit_bytes=vmem_limit),
            cost_estimate=pl.CostEstimate(
                flops=int(N * C * hw_pad + 4 * N * C * Cr),
                transcendentals=int(N * C),
                bytes_accessed=int(x_bytes + weight_bytes + N * C * 4)),
        )(x, w1t, b1_row, w2, b2_col)

        # ---- kernel 2: tiled channel-wise rescale (fully parallel grid) -----
        out = pl.pallas_call(
            _rescale_kernel,
            out_shape=jax.ShapeDtypeStruct((N, C, hw_pad), x.dtype),
            grid_spec=pltpu.PrefetchScalarGridSpec(
                num_scalar_prefetch=0,
                grid=(N, T),
                in_specs=[
                    pl.BlockSpec((1, C, tile), lambda n, t: (n, 0, t)),
                    pl.BlockSpec((1, C, 1), lambda n, t: (n, 0, 0)),
                ],
                out_specs=pl.BlockSpec((1, C, tile), lambda n, t: (n, 0, t)),
            ),
            compiler_params=pltpu.CompilerParams(
                dimension_semantics=("parallel", "parallel"),
                vmem_limit_bytes=vmem_limit),
            cost_estimate=pl.CostEstimate(
                flops=int(N * C * hw_pad),
                transcendentals=0,
                bytes_accessed=int(2 * x_bytes + N * C * 4)),
        )(x, s)

    if hw_pad != HW:
        out = out[:, :, :HW]
    return out.reshape(N, C, H, W)


def ca_layer_ref(x, w1, b1, w2, b2):
    """Pure-JAX reference matching the PyTorch forward (NCHW)."""
    y = jnp.mean(x, axis=(2, 3))                                  # (N, C)
    y = jnp.einsum('nc,rc->nr', y, w1) + b1                       # (N, Cr)
    y = jnp.maximum(y, 0.0)
    y = jnp.einsum('nr,cr->nc', y, w2) + b2                       # (N, C)
    y = jax.nn.sigmoid(y)[:, :, None, None]
    return x * y


if __name__ == "__main__":
    def make_inputs(key, n, c, h, w, reduction):
        cr = c // reduction
        kx, k1, k2, k3, k4 = jax.random.split(key, 5)
        x = jax.random.normal(kx, (n, c, h, w), dtype=jnp.float32)
        w1 = jax.random.normal(k1, (cr, c), dtype=jnp.float32) * 0.1
        b1 = jax.random.normal(k2, (cr,), dtype=jnp.float32) * 0.1
        w2 = jax.random.normal(k3, (c, cr), dtype=jnp.float32) * 0.1
        b2 = jax.random.normal(k4, (c,), dtype=jnp.float32) * 0.1
        return x, w1, b1, w2, b2

    key = jax.random.PRNGKey(0)
    k_a, k_b = jax.random.split(key)

    # Case A: CALayer(channel=64, reduction=16), 16x16 patches -> fused path.
    xa, w1a, b1a, w2a, b2a = make_inputs(k_a, 2, 64, 16, 16, 16)
    out_a = jax.block_until_ready(ca_layer(xa, w1a, b1a, w2a, b2a))
    ref_a = ca_layer_ref(xa, w1a, b1a, w2a, b2a)
    assert out_a.shape == xa.shape
    assert jnp.allclose(out_a, ref_a, atol=1e-5, rtol=1e-5), "fused mismatch"

    # Case B: same inputs through the two-pass fallback with 2 HW tiles
    # (exercises the accumulator init/finalize and the rescale kernel).
    out_b = jax.block_until_ready(
        ca_layer(xa, w1a, b1a, w2a, b2a, force_two_pass=True, hw_tile=128))
    assert jnp.allclose(out_b, ref_a, atol=1e-5, rtol=1e-5), "two-pass mismatch"

    # Case C: odd spatial size (HW=120 -> padded to 128), different C/reduction.
    xc, w1c, b1c, w2c, b2c = make_inputs(k_b, 1, 32, 10, 12, 8)
    out_c = jax.block_until_ready(ca_layer(xc, w1c, b1c, w2c, b2c))
    ref_c = ca_layer_ref(xc, w1c, b1c, w2c, b2c)
    assert out_c.shape == xc.shape
    assert jnp.allclose(out_c, ref_c, atol=1e-5, rtol=1e-5), "padded mismatch"

    print("KERNEL_OK")
</pallas_src>

<mosaic_0001>
module attributes {stable_mosaic.version = 11 : i64} {
  func.func @_fused_kernel(%arg0: i32, %arg1: memref<1x64x256xf32, #tpu.memory_space<vmem>>, %arg2: memref<64x4xf32, #tpu.memory_space<vmem>>, %arg3: memref<1x4xf32, #tpu.memory_space<vmem>>, %arg4: memref<64x4xf32, #tpu.memory_space<vmem>>, %arg5: memref<64x1xf32, #tpu.memory_space<vmem>>, %arg6: memref<1x64x256xf32, #tpu.memory_space<vmem>>) attributes {dimension_semantics = [#tpu.dimension_semantics<parallel>], iteration_bounds = array<i64: 2>, scalar_prefetch = 0 : i64, scratch_operands = 0 : i64, tpu.core_type = #tpu.core_type<tc>, window_params = [{transform_indices = @transform_0, window_bounds = array<i64: 1, 64, 256>}, {pipeline_mode = #tpu.pipeline_mode<synchronous>, transform_indices = @transform_1, window_bounds = array<i64: 64, 4>}, {pipeline_mode = #tpu.pipeline_mode<synchronous>, transform_indices = @transform_2, window_bounds = array<i64: 1, 4>}, {pipeline_mode = #tpu.pipeline_mode<synchronous>, transform_indices = @transform_3, window_bounds = array<i64: 64, 4>}, {pipeline_mode = #tpu.pipeline_mode<synchronous>, transform_indices = @transform_4, window_bounds = array<i64: 64, 1>}, {transform_indices = @transform_5, window_bounds = array<i64: 1, 64, 256>}]} {
    %c0 = arith.constant 0 : index
    %c0_0 = arith.constant 0 : index
    %c0_1 = arith.constant 0 : index
    %0 = vector.load %arg1[%c0, %c0_0, %c0_1] : memref<1x64x256xf32, #tpu.memory_space<vmem>>, vector<1x64x256xf32>
    %1 = vector.shape_cast %0 : vector<1x64x256xf32> to vector<64x256xf32>
    %cst = arith.constant dense<0.000000e+00> : vector<64xf32>
    %2 = vector.multi_reduction <add>, %1, %cst [1] : vector<64x256xf32> to vector<64xf32>
    %3 = vector.shape_cast %2 : vector<64xf32> to vector<64x1xf32>
    %cst_2 = arith.constant 3.906250e-03 : f32
    %4 = vector.broadcast %cst_2 : f32 to vector<64x1xf32>
    %5 = arith.mulf %3, %4 : vector<64x1xf32>
    %c0_3 = arith.constant 0 : index
    %c0_4 = arith.constant 0 : index
    %6 = vector.load %arg2[%c0_3, %c0_4] : memref<64x4xf32, #tpu.memory_space<vmem>>, vector<64x4xf32>
    %7 = vector.broadcast %5 : vector<64x1xf32> to vector<64x4xf32>
    %8 = arith.mulf %6, %7 : vector<64x4xf32>
    %cst_5 = arith.constant dense<0.000000e+00> : vector<4xf32>
    %9 = vector.multi_reduction <add>, %8, %cst_5 [0] : vector<64x4xf32> to vector<4xf32>
    %10 = vector.shape_cast %9 : vector<4xf32> to vector<1x4xf32>
    %c0_6 = arith.constant 0 : index
    %c0_7 = arith.constant 0 : index
    %11 = vector.load %arg3[%c0_6, %c0_7] : memref<1x4xf32, #tpu.memory_space<vmem>>, vector<1x4xf32>
    %12 = arith.addf %10, %11 : vector<1x4xf32>
    %cst_8 = arith.constant 0.000000e+00 : f32
    %13 = vector.broadcast %cst_8 : f32 to vector<1x4xf32>
    %14 = arith.maximumf %12, %13 : vector<1x4xf32>
    %c0_9 = arith.constant 0 : index
    %c0_10 = arith.constant 0 : index
    %15 = vector.load %arg4[%c0_9, %c0_10] : memref<64x4xf32, #tpu.memory_space<vmem>>, vector<64x4xf32>
    %16 = vector.broadcast %14 : vector<1x4xf32> to vector<64x4xf32>
    %17 = arith.mulf %15, %16 : vector<64x4xf32>
    %cst_11 = arith.constant dense<0.000000e+00> : vector<64xf32>
    %18 = vector.multi_reduction <add>, %17, %cst_11 [1] : vector<64x4xf32> to vector<64xf32>
    %19 = vector.shape_cast %18 : vector<64xf32> to vector<64x1xf32>
    %c0_12 = arith.constant 0 : index
    %c0_13 = arith.constant 0 : index
    %20 = vector.load %arg5[%c0_12, %c0_13] : memref<64x1xf32, #tpu.memory_space<vmem>>, vector<64x1xf32>
    %21 = arith.addf %19, %20 : vector<64x1xf32>
    %22 = arith.negf %21 : vector<64x1xf32>
    %23 = math.exp %22 : vector<64x1xf32>
    %cst_14 = arith.constant 1.000000e+00 : f32
    %24 = vector.broadcast %cst_14 : f32 to vector<64x1xf32>
    %25 = arith.addf %24, %23 : vector<64x1xf32>
    %26 = arith.divf %24, %25 : vector<64x1xf32>
    %27 = vector.broadcast %26 : vector<64x1xf32> to vector<64x256xf32>
    %28 = arith.mulf %1, %27 : vector<64x256xf32>
    %c0_15 = arith.constant 0 : index
    %c0_16 = arith.constant 0 : index
    %c0_17 = arith.constant 0 : index
    %29 = vector.load %arg6[%c0_15, %c0_16, %c0_17] : memref<1x64x256xf32, #tpu.memory_space<vmem>>, vector<1x64x256xf32>
    %30 = vector.shape_cast %29 : vector<1x64x256xf32> to vector<64x256xf32>
    %31 = vector.shape_cast %28 : vector<64x256xf32> to vector<1x64x256xf32>
    tpu.vector_store %arg6[%c0_15, %c0_16, %c0_17], %31 {strides = array<i32>} : memref<1x64x256xf32, #tpu.memory_space<vmem>>, vector<1x64x256xf32>,
    return
  }
  func.func @transform_0(%arg0: i32) -> (i32, i32, i32) {
    %c0_i32 = arith.constant 0 : i32
    %c0_i32_0 = arith.constant 0 : i32
    %c0_i32_1 = arith.constant 0 : i32
    return %arg0, %c0_i32, %c0_i32_0 : i32, i32, i32
  }
  func.func @transform_1(%arg0: i32) -> (i32, i32) {
    %c0_i32 = arith.constant 0 : i32
    %c0_i32_0 = arith.constant 0 : i32
    %c0_i32_1 = arith.constant 0 : i32
    return %c0_i32, %c0_i32_0 : i32, i32
  }
  func.func @transform_2(%arg0: i32) -> (i32, i32) {
    %c0_i32 = arith.constant 0 : i32
    %c0_i32_0 = arith.constant 0 : i32
    %c0_i32_1 = arith.constant 0 : i32
    return %c0_i32, %c0_i32_0 : i32, i32
  }
  func.func @transform_3(%arg0: i32) -> (i32, i32) {
    %c0_i32 = arith.constant 0 : i32
    %c0_i32_0 = arith.constant 0 : i32
    %c0_i32_1 = arith.constant 0 : i32
    return %c0_i32, %c0_i32_0 : i32, i32
  }
  func.func @transform_4(%arg0: i32) -> (i32, i32) {
    %c0_i32 = arith.constant 0 : i32
    %c0_i32_0 = arith.constant 0 : i32
    %c0_i32_1 = arith.constant 0 : i32
    return %c0_i32, %c0_i32_0 : i32, i32
  }
  func.func @transform_5(%arg0: i32) -> (i32, i32, i32) {
    %c0_i32 = arith.constant 0 : i32
    %c0_i32_0 = arith.constant 0 : i32
    %c0_i32_1 = arith.constant 0 : i32
    return %arg0, %c0_i32, %c0_i32_0 : i32, i32, i32
  }
}

</mosaic_0001>

<bundles_post_ra>
// kernel: tpu_custom_call.1
= control target key start
LH: loop header
LB: loop body
LE: loop exit
PB: predicated region body
PF: predicated region fallthrough
CT: control target
= control target key end

     0   :  { %10 = vsyncpa [#allocation3], 0  ;;  %s1183_s0 = inlined_call_operand.hbm [shape: f32[2,64,256], index: 0, kind: input, shape index: {}]   ;;  %s1184_s1 = inlined_call_operand.vmem [shape: f32[64,4], index: 1, kind: input, shape index: {}]   ;;  %s1185_s2 = inlined_call_operand.vmem [shape: f32[1,4], index: 2, kind: input, shape index: {}]   ;;  %s1186_s3 = inlined_call_operand.vmem [shape: f32[64,4], index: 3, kind: input, shape index: {}]   ;;  %s1187_s4 = inlined_call_operand.vmem [shape: f32[64,1], index: 4, kind: input, shape index: {}]   ;;  %s1188_s5 = inlined_call_operand.hbm [shape: f32[2,64,256], index: 5, kind: output, shape index: {}]  }
   0x1   :  { %12 = vsyncpa [#allocation3 + $0x1], 0 }
   0x2   :  { %13 = vsyncpa [#allocation4], 0 }
   0x3   :  { %15 = vsyncpa [#allocation4 + $0x1], 0  ;;  %s843_s18 = smov 0   ;;  %s845_s19 = smov 0  }
   0x4   :  { %s847_s20 = smov 0   ;;  %s849_s21 = smov 0  }
   0x5 LB: > { %s864_s22 = sadd.s32 4294967295, %s804_s21   ;;  %s599_s23 = sadd.s32 4294967294, %s804_s21   ;;  %s804_s21 = sphi %s849_s21, %s1201_s21   ;;  %s800_s20 = sphi %s847_s20, %s1200_s20   ;;  %s796_s19 = sphi %s845_s19, %s1199_s19   ;;  %s792_s18 = sphi %s843_s18, %s1198_s18  }
   0x6   : > { %s868_s24 = sadd.s32 1, %s804_s21   ;;  %s28_s25 = sadd.s32 1, %s800_s20 }
   0x7   : > { %s25_s26 = ssub.s32 %s804_s21, %s868_s24  ;;  %p35_p0 = scmp.ne.s32.totalorder %s800_s20, %s796_s19 }
   0x8   : > { %p26_p1 = scmp.eq.s32.totalorder %s25_s26, 0  ;;  %p36_p2 = scmp.eq.s32.totalorder %s804_s21, 0 }
   0x9   : > { %p41_p3 = scmp.ne.s32.totalorder %s796_s19, %s792_s18  ;;  %p42_p4 = scmp.eq.s32.totalorder %s864_s22, 0 }
   0xa   : > { %s880_s27 = scalar_select %p26_p1, %s800_s20, %s28_s25  }
   0xb   : > { %p882_p5 = por %p36_p2, %p35_p0  ;;  %p886_p6 = por %p42_p4, %p41_p3 }
   0xc   : > { %p149_p7 = scmp.eq.s32.totalorder %s864_s22, 1  ;;  %p155_p8 = scmp.eq.s32.totalorder %s599_s23, 1 }
   0xd   : > { %p635_p10 = scmp.lt.s32.totalorder %s804_s21, 2  ;;  %s187_s7 = sand.u32 1, %s800_s20  }
   0xe   : > { %p893_p11 = por %p149_p7, %p35_p0  ;;  %p897_p12 = por %p155_p8, %p41_p3 }
   0xf   : > { %s621_s8 = sshll.u32 %s804_s21, 11  ;;  %s602_s9 = sshll.u32 %s187_s7, 7 }
  0x10   : > { %s1192_s30 = scalar_select %p893_p11, 1, 0 }
  0x11   : > { %s1193_s6 = scalar_select %p897_p12, 1, 0 }
  0x12   : > { %s906_s12 = scalar_lea.hbm %s1183_s0, %s621_s8  ;;  %s191_s13 = scalar_lea.vmem [#allocation2], %s602_s9 }
  0x13   : > { %s198_s14 = sshll.u32 %s191_s13, 4  ;;  %p910_p13 = pnand %p635_p10, %p882_p5  ;;  %s914_s14 = int_to_ptr.vmem [resolvable:$true] %s198_s14 }
  0x14   : > { %s916_s16 = scalar_lea.sflag [#allocation3], %s187_s7  ;;  %s708_s17 = scalar_lea.hbm %s906_s12, 2048 }
  0x15   : > { %p709_p0 = scmp.ne.s32.totalorder %s906_s12, %s708_s17  ;;  %p710_p1 = pneg %p910_p13 }
  0x16   : > { %s713_s26 = scalar_lea.hbm %s1183_s0, 4096  ;;  %p714_p4 = scmp.lt.u32.totalorder %s906_s12, %s1183_s0 }
  0x17   : > { %p711_p2 = pnand %p710_p1, %p709_p0  ;;  %p715_p5 = scmp.lt.u32.totalorder %s713_s26, %s708_s17 }
  0x18   : > { %p717_p8 = scmp.lt.u32.totalorder %s708_s17, %s906_s12 }
  0x19   : > { %p712_p3 = pneg %p711_p2  ;;  %p716_p7 = por %p715_p5, %p714_p4 }
  0x1b   : > { %p718_p10 = por %p717_p8, %p716_p7 }
  0x1d   : > { %p719_p9 = pnand %p718_p10, %p712_p3 }
  0x1f   : > { %722 = shalt.err (!%p719_p9)
}
  0x20   : > { %s723_s7 = scalar_lea.vmem %s914_s14, 2048  ;;  %s806_s9 = smov [#allocation2]  }
  0x21   : > { %p724_p0 = scmp.ne.s32.totalorder %s914_s14, %s723_s7  ;;  %s728_s10 = sshll.u32 %s806_s9, 4  ;;  %s729_s10 = int_to_ptr.vmem [resolvable:$false] %s728_s10 }
  0x22   : > { %s730_s11 = scalar_lea.vmem %s729_s10, 4096  ;;  %p731_p11 = scmp.lt.s32.totalorder %s914_s14, %s729_s10 }
  0x23   : > { %p726_p2 = pnand %p724_p0, %p710_p1  ;;  %p732_p4 = scmp.lt.s32.totalorder %s730_s11, %s723_s7 }
  0x25   : > { %p727_p12 = pneg %p726_p2  ;;  %p733_p5 = por %p732_p4, %p731_p11 }
  0x27   : > { %p734_p7 = pnand %p733_p5, %p727_p12 }
  0x29   : > { %737 = shalt.err (!%p734_p7)
}
  0x2a   : > { %s807_s13 = smov 256   ;;  %s808_s17 = smov 16  }
  0x2b   : > { %630 = dma.hbm_to_vmem [thread:$0]  (!%p910_p13), %s906_s12, 2048, %s914_s14, %s916_s16, %s807_s13, %s807_s13, %s808_s17  }
  0x2c   : > { %p605_p9 = scmp.ge.s32.totalorder %s804_s21, 1  ;;  %p206_p1 = scmp.lt.s32.totalorder %s804_s21, 3 }
  0x2e   : > { %p207_p3 = pnand %p605_p9, %p206_p1 }
  0x2f   : > { %s947_s23 = sand.u32 (!%p207_p3), 1, %s796_s19  }
  0x30   : > { %210 = sbr.rel (%p207_p3) target bundleno = 585 (0x249), region = 40  ;;  %s606_s25 = sshll.u32 (!%p207_p3), %s947_s23, 7 }
  0x31   : > { %s213_s26 = scalar_lea.sflag (!%p207_p3), [#allocation3], %s947_s23  ;;  %s216_s28 = scalar_lea.vmem (!%p207_p3), [#allocation2], %s606_s25 }
  0x37   : > { %783 = dma.done.wait (%p886_p6), %s213_s26, 2048  }
  0x38   : > { %785 = vsyncadd (%p886_p6), %s213_s26, 4294965248  ;;  %v957_v0 = vld [vmem:[%s216_s28] sm:$0xff]  ;;  %v959_v1 = vld [vmem:[%s216_s28 + $0x8] sm:$0xff]  ;;  %vm307_vm0 = vcmask 31744   ;;  %s1102_s10 = scalar_lea.vmem [#allocation5], %s606_s25  ;;  %s622_s25 = sshll.u32 %s864_s22, 11 }
  0x39   : > { %v961_v2 = vld [vmem:[%s216_s28 + $0x20] sm:$0xff]  ;;  %v259_v3 = vadd.f32 %v959_v1, %v957_v0  ;;  %v965_v4 = vld [vmem:[%s216_s28 + $0x28] sm:$0xff]  ;;  %v967_v5 = vld [vmem:[%s216_s28 + $0x10] sm:$0xff]  ;;  %s526_s11 = sshll.u32 %s1102_s10, 4  ;;  %s1133_s26 = scalar_lea.hbm %s1188_s5, %s622_s25  ;;  %s1135_s11 = int_to_ptr.vmem [resolvable:$true] %s526_s11 }
  0x3a   : > { %v969_v6 = vld [vmem:[%s216_s28 + $0x18] sm:$0xff]  ;;  %v265_v7 = vadd.f32 %v965_v4, %v961_v2  ;;  %v973_v8 = vld [vmem:[%s216_s28 + $0x30] sm:$0xff]  ;;  %v981_v12 = vld [vmem:[%s216_s28 + $0x40] sm:$0xff]  ;;  %s513_s22 = scalar_lea.sflag [#allocation4], %s947_s23  ;;  %p1195_p11 = scmp.ne.s32.totalorder %s1192_s30, 0 }
  0x3b   : > { %v975_v9 = vld [vmem:[%s216_s28 + $0x38] sm:$0xff]  ;;  %260 = vadd.xlane.f32.xlu0 %v259_v3  ;;  %v262_v10 = vadd.f32 %v969_v6, %v967_v5  ;;  %v983_v13 = vld [vmem:[%s216_s28 + $0x48] sm:$0xff]  ;;  %v985_v14 = vld [vmem:[%s216_s28 + $0x50] sm:$0xff]  ;;  %s810_s29 = smov [#allocation5]  }
  0x3c   : > { %266 = vadd.xlane.f32.xlu1 %v265_v7  ;;  %v268_v11 = vadd.f32 %v975_v9, %v973_v8  ;;  %v987_v15 = vld [vmem:[%s216_s28 + $0x58] sm:$0xff]  ;;  %v271_v16 = vadd.f32 %v983_v13, %v981_v12  ;;  %v993_v18 = vld [vmem:[%s216_s28 + $0x60] sm:$0xff]  ;;  %v995_v19 = vld [vmem:[%s216_s28 + $0x68] sm:$0xff]  ;;  %s742_s12 = sshll.u32 %s810_s29, 4  ;;  %s743_s12 = int_to_ptr.vmem [resolvable:$false] %s742_s12 }
  0x3d   : > { %v274_v17 = vadd.f32 %v987_v15, %v985_v14  ;;  %v997_v20 = vld [vmem:[%s216_s28 + $0x70] sm:$0xff]  ;;  %v999_v21 = vld [vmem:[%s216_s28 + $0x78] sm:$0xff]  ;;  %v277_v22 = vadd.f32 %v995_v19, %v993_v18  ;;  %v291_v27 = vld [vmem:[%s1184_s1] sm:$0xff]  ;;  %s738_s28 = scalar_lea.vmem %s1135_s11, 2048  ;;  %s744_s14 = scalar_lea.vmem %s743_s12, 4096 }
  0x3e   : > { %v280_v23 = vadd.f32 %v999_v21, %v997_v20  ;;  %v293_v29 = vld [vmem:[%s1184_s1 + $0x10] sm:$0xff]  ;;  %v292_v30 = vld [vmem:[%s1184_s1 + $0x8] sm:$0xff]  ;;  %v294_v34 = vld [vmem:[%s1184_s1 + $0x18] sm:$0xff]  ;;  %p739_p6 = scmp.ne.s32.totalorder %s1135_s11, %s738_s28  ;;  %p745_p8 = scmp.lt.s32.totalorder %s1135_s11, %s743_s12 }
  0x3f   : > { %263 = vadd.xlane.f32.xlu0 %v262_v10  ;;  %v295_v40 = vld [vmem:[%s1184_s1 + $0x20] sm:$0xff]  ;;  %v296_v45 = vld [vmem:[%s1184_s1 + $0x28] sm:$0xff]  ;;  %v297_v54 = vld [vmem:[%s1184_s1 + $0x30] sm:$0xff]  ;;  %p746_p10 = scmp.lt.s32.totalorder %s744_s14, %s738_s28 }
  0x40   : > { %269 = vadd.xlane.f32.xlu1 %v268_v11  ;;  %v298_v58 = vld [vmem:[%s1184_s1 + $0x38] sm:$0xff]  ;;  %p740_p12 = pnand %p739_p6, %p1195_p11 }
  0x41   : > { %p747_p0 = por %p746_p10, %p745_p8 }
  0x42   : > { %p741_p13 = pneg %p740_p12 }
  0x43   : > { %272 = vadd.xlane.f32.xlu0 %v271_v16 }
  0x44   : > { %275 = vadd.xlane.f32.xlu1 %v274_v17  ;;  %p748_p2 = pnand %p747_p0, %p741_p13 }
  0x47   : > { %278 = vadd.xlane.f32.xlu0 %v277_v22 }
  0x48   : > { %281 = vadd.xlane.f32.xlu1 %v280_v23 }
  0xc8   : > { %v261_v24 = vpop.xlane.xlu0 %260 }
  0xc9   : > { %v283_v25 = vmul.f32 0.00390625, %v261_v24  ;;  %v267_v26 = vpop.xlane.xlu1 %266 }
  0xca   : > { %v285_v28 = vmul.f32 0.00390625, %v267_v26 }
  0xcb   : > { %v299_v32 = vmul.f32 %v291_v27, %v283_v25  ;;  %v340_v25 = vlaneseq }
  0xcc   : > { %v264_v31 = vpop.xlane.xlu0 %263  ;;  %v301_v37 = vmul.f32 %v293_v29, %v285_v28 }
  0xcd   : > { %v284_v33 = vmul.f32 0.00390625, %v264_v31  ;;  %v270_v35 = vpop.xlane.xlu1 %269  ;;  %v308_v42 = vsel %vm307_vm0, %v299_v32, 0.0  ;;  %v341_v28 = vshrl.u32 %v340_v25, 7 }
  0xce   : > { %v286_v36 = vmul.f32 0.00390625, %v270_v35  ;;  %v311_v49 = vsel %vm307_vm0, %v301_v37, 0.0  ;;  %v333_v35 = vld [vmem:[%s1186_s3 + $0x8] sm:$0xff] }
  0xcf   : > { %v300_v38 = vmul.f32 %v292_v30, %v284_v33  ;;  %v329_v30 = vld [vmem:[%s1185_s2] sm:$0x1]  ;;  %v342_v32 = vsub.s32 0, %v341_v28 }
  0xd0   : > { %v302_v39 = vmul.f32 %v294_v34, %v286_v36  ;;  %v273_v41 = vpop.xlane.xlu0 %272  ;;  %v332_v36 = vld [vmem:[%s1186_s3] sm:$0xff] }
  0xd1   : > { %v309_v43 = vsel %vm307_vm0, %v300_v38, 0.0  ;;  %v287_v44 = vmul.f32 0.00390625, %v273_v41  ;;  %v276_v46 = vpop.xlane.xlu1 %275  ;;  %v335_v38 = vld [vmem:[%s1186_s3 + $0x18] sm:$0xff]  ;;  %v380_v28 = vld [vmem:[%s1187_s4 + $0x20] sm:$0xff] }
  0xd2   : > { %v310_v47 = vadd.f32 %v309_v43, %v308_v42  ;;  %v288_v48 = vmul.f32 0.00390625, %v276_v46  ;;  %v313_v50 = vsel %vm307_vm0, %v302_v39, 0.0  ;;  %v334_v39 = vld [vmem:[%s1186_s3 + $0x10] sm:$0xff]  ;;  %v337_v46 = vld [vmem:[%s1186_s3 + $0x28] sm:$0xff] }
  0xd3   : > { %v303_v51 = vmul.f32 %v295_v40, %v287_v44 }
  0xd4   : > { %v312_v52 = vadd.f32 %v311_v49, %v310_v47  ;;  %v304_v53 = vmul.f32 %v296_v45, %v288_v48  ;;  %v279_v55 = vpop.xlane.xlu0 %278  ;;  %v336_v47 = vld [vmem:[%s1186_s3 + $0x20] sm:$0xff] }
  0xd5   : > { %v315_v56 = vsel %vm307_vm0, %v303_v51, 0.0  ;;  %v289_v57 = vmul.f32 0.00390625, %v279_v55  ;;  %v282_v59 = vpop.xlane.xlu1 %281 }
  0xd6   : > { %v314_v60 = vadd.f32 %v313_v50, %v312_v52  ;;  %v290_v61 = vmul.f32 0.00390625, %v282_v59  ;;  %v317_v62 = vsel %vm307_vm0, %v304_v53, 0.0  ;;  %v339_v52 = vld [vmem:[%s1186_s3 + $0x38] sm:$0xff]  ;;  %v338_v53 = vld [vmem:[%s1186_s3 + $0x30] sm:$0xff] }
  0xd7   : > { %v305_v63 = vmul.f32 %v297_v54, %v289_v57 }
  0xd8   : > { %v316_v3 = vadd.f32 %v315_v56, %v314_v60  ;;  %v306_v7 = vmul.f32 %v298_v58, %v290_v61  ;;  %v809_v60 = vmov 0   ;;  %v377_v61 = vld [vmem:[%s1187_s4 + $0x8] sm:$0xff] }
  0xd9   : > { %v319_v10 = vsel %vm307_vm0, %v305_v63, 0.0  ;;  %675 = vset.pattern.permute.xlu1 %v809_v60  ;;  %674 = vset.pattern.permute.xlu0 %v809_v60 }
  0xda   : > { %v318_v11 = vadd.f32 %v317_v62, %v316_v3  ;;  %v321_v16 = vsel %vm307_vm0, %v306_v7, 0.0  ;;  %v376_v62 = vld [vmem:[%s1187_s4] sm:$0xff] }
  0xdc   : > { %v320_v17 = vadd.f32 %v319_v10, %v318_v11  ;;  %v379_v11 = vld [vmem:[%s1187_s4 + $0x18] sm:$0xff] }
  0xde   : > { %v322_v22 = vadd.f32 %v321_v16, %v320_v17  ;;  %v378_v16 = vld [vmem:[%s1187_s4 + $0x10] sm:$0xff] }
  0xe0   : > { %v323_v23 = vrot.slane %v322_v22, 4 }
  0xe2   : > { %v324_v24 = vadd.f32 %v323_v23, %v322_v22 }
  0xe4   : > { %v325_v26 = vrot.slane %v324_v24, 2 }
  0xe6   : > { %v326_v27 = vadd.f32 %v325_v26, %v324_v24 }
  0xe8   : > { %v327_v29 = vrot.slane %v326_v27, 1 }
  0xea   : > { %v328_v31 = vadd.f32 %v327_v29, %v326_v27  ;;  %v381_v27 = vld [vmem:[%s1187_s4 + $0x28] sm:$0xff] }
  0xec   : > { %v330_v33 = vadd.f32 %v329_v30, %v328_v31 }
  0xee   : > { %v331_v34 = vmax.f32 %v330_v33, 0.0 }
  0xf0   : > { %v343_v37 = vrot.slane %v331_v34, %v342_v32 }
  0xf2   : > { %v345_v40 = vmul.f32 %v343_v37, %v333_v35  ;;  %v344_v41 = vmul.f32 %v343_v37, %v332_v36  ;;  %v347_v44 = vmul.f32 %v343_v37, %v335_v38  ;;  %v346_v45 = vmul.f32 %v343_v37, %v334_v39  ;;  %v382_v36 = vld [vmem:[%s1187_s4 + $0x30] sm:$0xff] }
  0xf3   : > { %v349_v50 = vmul.f32 %v343_v37, %v337_v46  ;;  %v348_v51 = vmul.f32 %v343_v37, %v336_v47  ;;  %v351_v56 = vmul.f32 %v343_v37, %v339_v52  ;;  %v350_v57 = vmul.f32 %v343_v37, %v338_v53 }
  0xf4   : > { %v355_v42 = vsel %vm307_vm0, %v345_v40, 0.0  ;;  %v352_v43 = vsel %vm307_vm0, %v344_v41, 0.0  ;;  %v361_v48 = vsel %vm307_vm0, %v347_v44, 0.0  ;;  %v358_v49 = vsel %vm307_vm0, %v346_v45, 0.0  ;;  %v383_v41 = vld [vmem:[%s1187_s4 + $0x38] sm:$0xff] }
  0xf5   : > { %356 = vadd.xlane.f32.xlu1 %v355_v42  ;;  %353 = vadd.xlane.f32.xlu0 %v352_v43  ;;  %v367_v54 = vsel %vm307_vm0, %v349_v50, 0.0  ;;  %v364_v55 = vsel %vm307_vm0, %v348_v51, 0.0  ;;  %v373_v58 = vsel %vm307_vm0, %v351_v56, 0.0  ;;  %v370_v59 = vsel %vm307_vm0, %v350_v57, 0.0 }
  0xf9   : > { %362 = vadd.xlane.f32.xlu1 %v361_v48  ;;  %359 = vadd.xlane.f32.xlu0 %v358_v49 }
  0xfd   : > { %368 = vadd.xlane.f32.xlu1 %v367_v54  ;;  %365 = vadd.xlane.f32.xlu0 %v364_v55 }
 0x101   : > { %374 = vadd.xlane.f32.xlu1 %v373_v58  ;;  %371 = vadd.xlane.f32.xlu0 %v370_v59 }
 0x182   : > { %v357_v63 = vpop.xlane.xlu1 %356  ;;  %v354_v3 = vpop.xlane.xlu0 %353 }
 0x183   : > { %v385_v7 = vadd.f32 %v377_v61, %v357_v63  ;;  %v384_v10 = vadd.f32 %v376_v62, %v354_v3 }
 0x185   : > { %v609_v17 = vmul.f32 -1.442695, %v385_v7  ;;  %v608_v22 = vmul.f32 -1.442695, %v384_v10 }
 0x186   : > { %v363_v23 = vpop.xlane.xlu1 %362  ;;  %v360_v24 = vpop.xlane.xlu0 %359 }
 0x187   : > { %676 = vpow2.f32 %v609_v17  ;;  %v387_v25 = vadd.f32 %v379_v11, %v363_v23  ;;  %v386_v26 = vadd.f32 %v378_v16, %v360_v24 }
 0x188   : > { %678 = vpow2.f32 %v608_v22 }
 0x189   : > { %v611_v29 = vmul.f32 -1.442695, %v387_v25  ;;  %v610_v30 = vmul.f32 -1.442695, %v386_v26 }
 0x18a   : > { %v369_v31 = vpop.xlane.xlu1 %368  ;;  %v366_v32 = vpop.xlane.xlu0 %365 }
 0x18b   : > { %680 = vpow2.f32 %v611_v29  ;;  %v389_v33 = vadd.f32 %v381_v27, %v369_v31  ;;  %v388_v34 = vadd.f32 %v380_v28, %v366_v32 }
 0x18c   : > { %682 = vpow2.f32 %v610_v30 }
 0x18d   : > { %v612_v35 = vmul.f32 -1.442695, %v388_v34  ;;  %v613_v38 = vmul.f32 -1.442695, %v389_v33 }
 0x18e   : > { %v372_v37 = vpop.xlane.xlu0 %371  ;;  %v375_v42 = vpop.xlane.xlu1 %374 }
 0x18f   : > { %684 = vpow2.f32 %v612_v35  ;;  %v390_v39 = vadd.f32 %v382_v36, %v372_v37  ;;  %v391_v46 = vadd.f32 %v383_v41, %v375_v42 }
 0x190   : > { %686 = vpow2.f32 %v613_v38 }
 0x191   : > { %v677_v40 = vpop.eup %676  ;;  %v614_v47 = vmul.f32 -1.442695, %v390_v39  ;;  %v615_v51 = vmul.f32 -1.442695, %v391_v46 }
 0x192   : > { %v679_v43 = vpop.eup %678  ;;  %v417_v44 = vadd.f32 1.0, %v677_v40 }
 0x193   : > { %v416_v45 = vadd.f32 1.0, %v679_v43 }
 0x194   : > { %688 = vrcp.f32 %v417_v44 }
 0x195   : > { %v681_v48 = vpop.eup %680  ;;  %690 = vrcp.f32 %v416_v45 }
 0x196   : > { %v683_v49 = vpop.eup %682  ;;  %692 = vpow2.f32 %v614_v47  ;;  %v419_v52 = vadd.f32 1.0, %v681_v48 }
 0x197   : > { %v418_v50 = vadd.f32 1.0, %v683_v49 }
 0x199   : > { %694 = vrcp.f32 %v418_v50  ;;  %v685_v53 = vpop.eup %684 }
 0x19a   : > { %696 = vpow2.f32 %v615_v51  ;;  %v687_v54 = vpop.eup %686  ;;  %v420_v55 = vadd.f32 1.0, %v685_v53 }
 0x19b   : > { %698 = vrcp.f32 %v419_v52  ;;  %v421_v58 = vadd.f32 1.0, %v687_v54 }
 0x19c   : > { %700 = vrcp.f32 %v420_v55 }
 0x19d   : > { %702 = vrcp.f32 %v421_v58 }
 0x19e   : > { %v689_v56 = vpop.eup %688 }
 0x19f   : > { %v691_v57 = vpop.eup %690  ;;  %447 = vperm.xlu1 %675, %v689_v56  }
 0x1a0   : > { %442 = vperm.xlu0 %674, %v691_v57   ;;  %v693_v59 = vpop.eup %692 }
 0x1a1   : > { %v422_v61 = vadd.f32 1.0, %v693_v59 }
 0x1a3   : > { %v695_v60 = vpop.eup %694  ;;  %704 = vrcp.f32 %v422_v61 }
 0x1a4   : > { %452 = vperm.xlu1 %675, %v695_v60   ;;  %v697_v62 = vpop.eup %696 }
 0x1a5   : > { %v699_v63 = vpop.eup %698  ;;  %v423_v3 = vadd.f32 1.0, %v697_v62 }
 0x1a6   : > { %v701_v7 = vpop.eup %700 }
 0x1a7   : > { %706 = vrcp.f32 %v423_v3  ;;  %v703_v10 = vpop.eup %702 }
 0x1a8   : > { %457 = vperm.xlu1 %675, %v699_v63  }
 0x1ac   : > { %462 = vperm.xlu1 %675, %v701_v7  }
 0x1ad   : > { %v705_v11 = vpop.eup %704 }
 0x1b0   : > { %467 = vperm.xlu1 %675, %v703_v10  }
 0x1b1   : > { %v707_v16 = vpop.eup %706 }
 0x1b4   : > { %472 = vperm.xlu1 %675, %v705_v11  }
 0x1b8   : > { %477 = vperm.xlu1 %675, %v707_v16  }
 0x21e   : > { %v448_v17 = vpop.permute.xlu1 %447 }
 0x21f   : > { %v482_v22 = vmul.f32 %v448_v17, %v967_v5  ;;  %v483_v23 = vmul.f32 %v448_v17, %v969_v6  ;;  %v443_v24 = vpop.permute.xlu0 %442 }
 0x220   : > { %v480_v25 = vmul.f32 %v443_v24, %v957_v0  ;;  %v481_v26 = vmul.f32 %v443_v24, %v959_v1 }
 0x221   : > { %498 = vst [vmem:[%s1102_s10 + $0x10] sm:$0xff] %v482_v22  ;;  %499 = vst [vmem:[%s1102_s10 + $0x18] sm:$0xff] %v483_v23 }
 0x222   : > { %496 = vst [vmem:[%s1102_s10] sm:$0xff] %v480_v25  ;;  %497 = vst [vmem:[%s1102_s10 + $0x8] sm:$0xff] %v481_v26 }
 0x223   : > { %v453_v0 = vpop.permute.xlu1 %452 }
 0x224   : > { %v484_v1 = vmul.f32 %v453_v0, %v961_v2  ;;  %v485_v5 = vmul.f32 %v453_v0, %v965_v4 }
 0x226   : > { %500 = vst [vmem:[%s1102_s10 + $0x20] sm:$0xff] %v484_v1  ;;  %501 = vst [vmem:[%s1102_s10 + $0x28] sm:$0xff] %v485_v5 }
 0x227   : > { %v458_v6 = vpop.permute.xlu1 %457 }
 0x228   : > { %v486_v27 = vmul.f32 %v458_v6, %v973_v8  ;;  %v487_v28 = vmul.f32 %v458_v6, %v975_v9 }
 0x22a   : > { %502 = vst [vmem:[%s1102_s10 + $0x30] sm:$0xff] %v486_v27  ;;  %503 = vst [vmem:[%s1102_s10 + $0x38] sm:$0xff] %v487_v28 }
 0x22b   : > { %v463_v29 = vpop.permute.xlu1 %462 }
 0x22c   : > { %v488_v2 = vmul.f32 %v463_v29, %v981_v12  ;;  %v489_v4 = vmul.f32 %v463_v29, %v983_v13 }
 0x22e   : > { %504 = vst [vmem:[%s1102_s10 + $0x40] sm:$0xff] %v488_v2  ;;  %505 = vst [vmem:[%s1102_s10 + $0x48] sm:$0xff] %v489_v4 }
 0x22f   : > { %v468_v30 = vpop.permute.xlu1 %467 }
 0x230   : > { %v490_v31 = vmul.f32 %v468_v30, %v985_v14  ;;  %v491_v8 = vmul.f32 %v468_v30, %v987_v15 }
 0x232   : > { %506 = vst [vmem:[%s1102_s10 + $0x50] sm:$0xff] %v490_v31  ;;  %507 = vst [vmem:[%s1102_s10 + $0x58] sm:$0xff] %v491_v8 }
 0x233   : > { %v473_v9 = vpop.permute.xlu1 %472 }
 0x234   : > { %v492_v32 = vmul.f32 %v473_v9, %v993_v18  ;;  %v493_v12 = vmul.f32 %v473_v9, %v995_v19 }
 0x236   : > { %508 = vst [vmem:[%s1102_s10 + $0x60] sm:$0xff] %v492_v32  ;;  %509 = vst [vmem:[%s1102_s10 + $0x68] sm:$0xff] %v493_v12 }
 0x237   : > { %v478_v13 = vpop.permute.xlu1 %477 }
 0x238   : > { %v494_v14 = vmul.f32 %v478_v13, %v997_v20  ;;  %v495_v15 = vmul.f32 %v478_v13, %v999_v21 }
 0x23a   : > { %510 = vst [vmem:[%s1102_s10 + $0x70] sm:$0xff] %v494_v14  ;;  %511 = vst [vmem:[%s1102_s10 + $0x78] sm:$0xff] %v495_v15 }
 0x23b   : > { %751 = shalt.err (!%p748_p2)
}
 0x23c   : > { %s752_s15 = scalar_lea.hbm %s1133_s26, 2048  ;;  %s756_s7 = scalar_lea.hbm %s1188_s5, 4096 }
 0x23d   : > { %p753_p4 = scmp.ne.s32.totalorder %s1133_s26, %s752_s15  ;;  %p757_p9 = scmp.lt.u32.totalorder %s1133_s26, %s1188_s5 }
 0x23e   : > { %p758_p1 = scmp.lt.u32.totalorder %s756_s7, %s752_s15  ;;  %p760_p6 = scmp.lt.u32.totalorder %s752_s15, %s1133_s26 }
 0x23f   : > { %p754_p5 = pnand %p753_p4, %p1195_p11 }
 0x240   : > { %p759_p3 = por %p758_p1, %p757_p9 }
 0x241   : > { %p755_p7 = pneg %p754_p5 }
 0x242   : > { %p761_p12 = por %p760_p6, %p759_p3 }
 0x244   : > { %p762_p13 = pnand %p761_p12, %p755_p7 }
 0x246   : > { %765 = shalt.err (!%p762_p13)
}
 0x247   : > { %s811_s25 = smov 256   ;;  %s812_s13 = smov 16  }
 0x248   : > { %625 = dma.vmem_to_hbm [thread:$0]  (%p1195_p11), %s1135_s11, 2048, %s1133_s26, %s513_s22, %s811_s25, %s811_s25, %s812_s13  }
 0x249 PF: > { %s541_s17 = sand.u32 1, %s792_s18   ;;  %p1196_p8 = scmp.ne.s32.totalorder %s1193_s6, 0 }
 0x24a   : > { %p1197_p10 = scmp.ge.s32.totalorder %s804_s21, 2  ;;  %s542_s28 = scalar_lea.sflag [#allocation4], %s541_s17 }
 0x24c   : > { %p632_p0 = pnand %p1197_p10, %p1196_p8 }
 0x24e   : > { %787 = dma.done.wait (!%p632_p0), %s542_s28, 2048  }
 0x24f   : > { %789 = vsyncadd (!%p632_p0), %s542_s28, 4294965248  ;;  %p18_p2 = scmp.ge.s32.totalorder %s868_s24, 4   ;;  %s1198_s18 = smov %s796_s19 }
 0x250   : > { %s1199_s19 = smov %s800_s20  ;;  %s1200_s20 = smov %s880_s27 }
 0x251   : > { %s1201_s21 = smov %s868_s24  ;;  %20 = sbr.rel (!%p18_p2) target bundleno = 5 (0x5), region = 85 }
 0x258   :  { %547 = vsyncpa [#allocation3], 1 }
 0x259   :  { %549 = vsyncpa [#allocation3 + $0x1], 1 }
 0x25a   :  { %550 = vsyncpa [#allocation4], 1 }
 0x25b   :  { %552 = vsyncpa [#allocation4 + $0x1], 1 }

</bundles_post_ra>
